<compile_context>
chip_gen: v5e
topology: v5e:2x2
jax: 0.10.0
libtpu: 0.0.40
codegen_flags: <defaults>
</compile_context>

<pallas_src>
import jax
import jax.numpy as jnp
from jax import lax
from jax.experimental import pallas as pl
from jax.experimental.pallas import tpu as pltpu


def _round_up(x, m):
    return ((x + m - 1) // m) * m


def _ffn_kernel(x_ref, w1_ref, b1_ref, w2_ref, b2_ref, o_ref, acc_ref):
    # x_ref:  (tm, dim)      w1_ref: (dim, tk)    b1_ref: (1, tk)  f32
    # w2_ref: (tk, dim)      b2_ref: (1, dim) f32
    # o_ref:  (tm, dim)      acc_ref: (tm, dim) f32 scratch
    k = pl.program_id(1)
    nk = pl.num_programs(1)

    @pl.when(k == 0)
    def _init():
        # Hoist the second bias into the accumulator init (once per row tile).
        acc_ref[...] = jnp.broadcast_to(b2_ref[...], acc_ref.shape)

    # First GEMM slice: (tm, dim) @ (dim, tk) -> (tm, tk), f32 accumulation.
    h = jnp.dot(x_ref[...], w1_ref[...], preferred_element_type=jnp.float32)
    h = h + b1_ref[...]
    # Exact GELU (erf form) in f32 — matches PyTorch nn.GELU() default.
    h = 0.5 * h * (1.0 + lax.erf(h * 0.7071067811865476))
    # Dropout(p=0.0) is identity -> no-op.

    # Second GEMM slice: (tm, tk) @ (tk, dim), accumulated over k in f32.
    acc_ref[...] += jnp.dot(h.astype(w2_ref.dtype), w2_ref[...],
                            preferred_element_type=jnp.float32)

    @pl.when(k == nk - 1)
    def _finalize():
        o_ref[...] = acc_ref[...].astype(o_ref.dtype)


def feed_forward(x, w1, b1, w2, b2, *, tm=256, tk=512, matmul_dtype=None):
    """x: (B, N, dim). Returns (B, N, dim).

    w1: (dim, hidden), b1: (hidden,), w2: (hidden, dim), b2: (dim,)
    matmul_dtype: optional dtype (e.g. jnp.bfloat16) for the MXU inputs;
    accumulation, biases and GELU stay in float32.
    """
    out_dtype = x.dtype
    B, N, dim = x.shape
    hidden = w1.shape[1]
    M = B * N

    mm_dtype = out_dtype if matmul_dtype is None else matmul_dtype

    x2d = x.reshape(M, dim).astype(mm_dtype)
    w1c = w1.astype(mm_dtype)
    w2c = w2.astype(mm_dtype)
    b1_2d = b1.reshape(1, hidden).astype(jnp.float32)
    b2_2d = b2.reshape(1, dim).astype(jnp.float32)

    # --- Tile sizing / padding (sublane multiple of 8, lane multiple of 128).
    tm = _round_up(min(tm, _round_up(M, 8)), 8)
    m_pad = _round_up(M, tm)
    if m_pad != M:
        x2d = jnp.pad(x2d, ((0, m_pad - M), (0, 0)))

    tk = _round_up(min(tk, _round_up(hidden, 128)), 128)
    h_pad = _round_up(hidden, tk)
    if h_pad != hidden:
        # Zero-padded hidden units: h = 0, GELU(0) = 0, contribute 0 to output.
        w1c = jnp.pad(w1c, ((0, 0), (0, h_pad - hidden)))
        b1_2d = jnp.pad(b1_2d, ((0, 0), (0, h_pad - hidden)))
        w2c = jnp.pad(w2c, ((0, h_pad - hidden), (0, 0)))

    grid = (m_pad // tm, h_pad // tk)

    # --- Scoped-VMEM budget from the actual tiles (double-buffered) + headroom.
    in_bytes = jnp.dtype(mm_dtype).itemsize
    out_bytes = jnp.dtype(out_dtype).itemsize
    vmem_est = (
        2 * (tm * dim * in_bytes          # x tile
             + dim * tk * in_bytes        # W1 slice
             + tk * 4                     # b1 slice (f32)
             + tk * dim * in_bytes        # W2 slice
             + dim * 4                    # b2 (f32)
             + tm * dim * out_bytes)      # out tile
        + tm * dim * 4                    # accumulator scratch
    )
    vmem_limit = int(min(64 * 1024 * 1024,
                         max(vmem_est + 4 * 1024 * 1024, 16 * 1024 * 1024)))

    cost = pl.CostEstimate(
        flops=4 * M * dim * hidden,                 # two GEMMs, 2 flops / MAC
        transcendentals=M * hidden,                 # erf
        bytes_accessed=(M * dim * in_bytes
                        + dim * hidden * in_bytes
                        + hidden * dim * in_bytes
                        + hidden * 4 + dim * 4
                        + M * dim * out_bytes),
    )

    out2d = pl.pallas_call(
        _ffn_kernel,
        out_shape=jax.ShapeDtypeStruct((m_pad, dim), out_dtype),
        grid_spec=pltpu.PrefetchScalarGridSpec(
            num_scalar_prefetch=0,
            grid=grid,
            in_specs=[
                pl.BlockSpec((tm, dim), lambda i, k: (i, 0)),   # x row tile
                pl.BlockSpec((dim, tk), lambda i, k: (0, k)),   # W1 K-slice
                pl.BlockSpec((1, tk), lambda i, k: (0, k)),     # b1 K-slice
                pl.BlockSpec((tk, dim), lambda i, k: (k, 0)),   # W2 K-slice
                pl.BlockSpec((1, dim), lambda i, k: (0, 0)),    # b2
            ],
            out_specs=pl.BlockSpec((tm, dim), lambda i, k: (i, 0)),
            scratch_shapes=[pltpu.VMEM((tm, dim), jnp.float32)],
        ),
        compiler_params=pltpu.CompilerParams(
            dimension_semantics=("parallel", "arbitrary"),
            vmem_limit_bytes=vmem_limit,
        ),
        cost_estimate=cost,
    )(x2d, w1c, b1_2d, w2c, b2_2d)

    return out2d[:M].reshape(B, N, dim)


def _reference(x, w1, b1, w2, b2):
    h = x @ w1 + b1
    h = 0.5 * h * (1.0 + lax.erf(h / jnp.sqrt(2.0)))
    return h @ w2 + b2


if __name__ == "__main__":
    key = jax.random.PRNGKey(0)

    # --- Small but lane-aligned shapes (dim multiple of 128). ---
    B, N, dim, hidden = 2, 8, 128, 256
    kx, k1, k2, k3, k4, k5 = jax.random.split(key, 6)
    x = jax.random.normal(kx, (B, N, dim), dtype=jnp.float32)
    # PyTorch Linear weight is (out, in); we store transposed (in, out).
    w1 = jax.random.normal(k1, (dim, hidden), dtype=jnp.float32) * 0.02
    b1 = jax.random.normal(k2, (hidden,), dtype=jnp.float32) * 0.01
    w2 = jax.random.normal(k3, (hidden, dim), dtype=jnp.float32) * 0.02
    b2 = jax.random.normal(k4, (dim,), dtype=jnp.float32) * 0.01

    ref = _reference(x.reshape(-1, dim), w1, b1, w2, b2).reshape(B, N, dim)

    # 1) Default path (f32 matmuls, single tile in each axis at this size).
    out = jax.block_until_ready(feed_forward(x, w1, b1, w2, b2))
    assert out.shape == (B, N, dim)
    assert jnp.allclose(out, ref, atol=1e-4, rtol=1e-4)

    # 2) Force multi-tile grid (exercises the K-reduction accumulator).
    out_tiled = jax.block_until_ready(
        feed_forward(x, w1, b1, w2, b2, tm=8, tk=128))
    assert jnp.allclose(out_tiled, ref, atol=1e-4, rtol=1e-4)

    # 3) bf16 MXU fast path (v6e/v7x), f32 accumulation — looser tolerance.
    out_bf16 = jax.block_until_ready(
        feed_forward(x, w1, b1, w2, b2, matmul_dtype=jnp.bfloat16))
    assert jnp.allclose(out_bf16, ref, atol=5e-2, rtol=5e-2)

    # 4) Ragged shapes (M and hidden not multiples of the tiles -> padding).
    B2, N2, dim2, hidden2 = 2, 7, 128, 384
    x2 = jax.random.normal(k5, (B2, N2, dim2), dtype=jnp.float32)
    w1b = jax.random.normal(k1, (dim2, hidden2), dtype=jnp.float32) * 0.02
    b1b = jax.random.normal(k2, (hidden2,), dtype=jnp.float32) * 0.01
    w2b = jax.random.normal(k3, (hidden2, dim2), dtype=jnp.float32) * 0.02
    b2b = jax.random.normal(k4, (dim2,), dtype=jnp.float32) * 0.01
    out2 = jax.block_until_ready(
        feed_forward(x2, w1b, b1b, w2b, b2b, tk=256))
    ref2 = _reference(x2.reshape(-1, dim2), w1b, b1b, w2b, b2b).reshape(
        B2, N2, dim2)
    assert out2.shape == (B2, N2, dim2)
    assert jnp.allclose(out2, ref2, atol=1e-4, rtol=1e-4)

    print("KERNEL_OK")
</pallas_src>

<mosaic_0001>
module attributes {stable_mosaic.version = 11 : i64} {
  func.func @_ffn_kernel(%arg0: i32, %arg1: i32, %arg2: memref<16x128xf32, #tpu.memory_space<vmem>>, %arg3: memref<128x256xf32, #tpu.memory_space<vmem>>, %arg4: memref<1x256xf32, #tpu.memory_space<vmem>>, %arg5: memref<256x128xf32, #tpu.memory_space<vmem>>, %arg6: memref<1x128xf32, #tpu.memory_space<vmem>>, %arg7: memref<16x128xf32, #tpu.memory_space<vmem>>, %arg8: memref<16x128xf32, #tpu.memory_space<vmem>>) attributes {dimension_semantics = [#tpu.dimension_semantics<parallel>, #tpu.dimension_semantics<arbitrary>], iteration_bounds = array<i64: 1, 1>, scalar_prefetch = 0 : i64, scratch_operands = 1 : i64, tpu.core_type = #tpu.core_type<tc>, window_params = [{transform_indices = @transform_0, window_bounds = array<i64: 16, 128>}, {transform_indices = @transform_1, window_bounds = array<i64: 128, 256>}, {transform_indices = @transform_2, window_bounds = array<i64: 1, 256>}, {transform_indices = @transform_3, window_bounds = array<i64: 256, 128>}, {pipeline_mode = #tpu.pipeline_mode<synchronous>, transform_indices = @transform_4, window_bounds = array<i64: 1, 128>}, {transform_indices = @transform_5, window_bounds = array<i64: 16, 128>}]} {
    %c0_i32 = arith.constant 0 : i32
    %0 = arith.cmpi eq, %arg1, %c0_i32 : i32
    %1 = arith.extui %0 : i1 to i32
    %c0_i32_0 = arith.constant 0 : i32
    %2 = arith.cmpi ne, %1, %c0_i32_0 : i32
    scf.if %2 {
      %c0_18 = arith.constant 0 : index
      %c0_19 = arith.constant 0 : index
      %25 = vector.load %arg6[%c0_18, %c0_19] : memref<1x128xf32, #tpu.memory_space<vmem>>, vector<1x128xf32>
      %26 = vector.shape_cast %25 : vector<1x128xf32> to vector<1x128xf32>
      %27 = vector.broadcast %26 : vector<1x128xf32> to vector<16x128xf32>
      %c0_20 = arith.constant 0 : index
      %c0_21 = arith.constant 0 : index
      %28 = vector.load %arg8[%c0_20, %c0_21] : memref<16x128xf32, #tpu.memory_space<vmem>>, vector<16x128xf32>
      tpu.vector_store %arg8[%c0_20, %c0_21], %27 {strides = array<i32>} : memref<16x128xf32, #tpu.memory_space<vmem>>, vector<16x128xf32>,
    } else {
    }
    %c0 = arith.constant 0 : index
    %c0_1 = arith.constant 0 : index
    %3 = vector.load %arg2[%c0, %c0_1] : memref<16x128xf32, #tpu.memory_space<vmem>>, vector<16x128xf32>
    %c0_2 = arith.constant 0 : index
    %c0_3 = arith.constant 0 : index
    %4 = vector.load %arg3[%c0_2, %c0_3] : memref<128x256xf32, #tpu.memory_space<vmem>>, vector<128x256xf32>
    %cst = arith.constant dense<0.000000e+00> : vector<16x256xf32>
    %5 = tpu.matmul %3, %4, %cst {dimension_numbers = #tpu.dot_dimension_numbers<[1], [0], [0], [1], [0, 0, 1, 1], [], []>} : vector<16x128xf32>, vector<128x256xf32>, vector<16x256xf32> -> vector<16x256xf32>
    %c0_4 = arith.constant 0 : index
    %c0_5 = arith.constant 0 : index
    %6 = vector.load %arg4[%c0_4, %c0_5] : memref<1x256xf32, #tpu.memory_space<vmem>>, vector<1x256xf32>
    %7 = vector.broadcast %6 : vector<1x256xf32> to vector<16x256xf32>
    %8 = arith.addf %5, %7 : vector<16x256xf32>
    %cst_6 = arith.constant 5.000000e-01 : f32
    %9 = vector.broadcast %cst_6 : f32 to vector<16x256xf32>
    %10 = arith.mulf %9, %8 : vector<16x256xf32>
    %cst_7 = arith.constant 0.707106769 : f32
    %11 = vector.broadcast %cst_7 : f32 to vector<16x256xf32>
    %12 = arith.mulf %8, %11 : vector<16x256xf32>
    %13 = math.erf %12 : vector<16x256xf32>
    %cst_8 = arith.constant 1.000000e+00 : f32
    %14 = vector.broadcast %cst_8 : f32 to vector<16x256xf32>
    %15 = arith.addf %14, %13 : vector<16x256xf32>
    %16 = arith.mulf %10, %15 : vector<16x256xf32>
    %c0_9 = arith.constant 0 : index
    %c0_10 = arith.constant 0 : index
    %17 = vector.load %arg8[%c0_9, %c0_10] : memref<16x128xf32, #tpu.memory_space<vmem>>, vector<16x128xf32>
    %c0_11 = arith.constant 0 : index
    %c0_12 = arith.constant 0 : index
    %18 = vector.load %arg5[%c0_11, %c0_12] : memref<256x128xf32, #tpu.memory_space<vmem>>, vector<256x128xf32>
    %cst_13 = arith.constant dense<0.000000e+00> : vector<16x128xf32>
    %19 = tpu.matmul %16, %18, %cst_13 {dimension_numbers = #tpu.dot_dimension_numbers<[1], [0], [0], [1], [0, 0, 1, 1], [], []>} : vector<16x256xf32>, vector<256x128xf32>, vector<16x128xf32> -> vector<16x128xf32>
    %20 = arith.addf %17, %19 : vector<16x128xf32>
    %c0_14 = arith.constant 0 : index
    %c0_15 = arith.constant 0 : index
    %21 = vector.load %arg8[%c0_14, %c0_15] : memref<16x128xf32, #tpu.memory_space<vmem>>, vector<16x128xf32>
    tpu.vector_store %arg8[%c0_14, %c0_15], %20 {strides = array<i32>} : memref<16x128xf32, #tpu.memory_space<vmem>>, vector<16x128xf32>,
    %c0_i32_16 = arith.constant 0 : i32
    %22 = arith.cmpi eq, %arg1, %c0_i32_16 : i32
    %23 = arith.extui %22 : i1 to i32
    %c0_i32_17 = arith.constant 0 : i32
    %24 = arith.cmpi ne, %23, %c0_i32_17 : i32
    scf.if %24 {
      %c0_18 = arith.constant 0 : index
      %c0_19 = arith.constant 0 : index
      %25 = vector.load %arg8[%c0_18, %c0_19] : memref<16x128xf32, #tpu.memory_space<vmem>>, vector<16x128xf32>
      %c0_20 = arith.constant 0 : index
      %c0_21 = arith.constant 0 : index
      %26 = vector.load %arg7[%c0_20, %c0_21] : memref<16x128xf32, #tpu.memory_space<vmem>>, vector<16x128xf32>
      tpu.vector_store %arg7[%c0_20, %c0_21], %25 {strides = array<i32>} : memref<16x128xf32, #tpu.memory_space<vmem>>, vector<16x128xf32>,
    } else {
    }
    return
  }
  func.func @transform_0(%arg0: i32, %arg1: i32) -> (i32, i32) {
    %c0_i32 = arith.constant 0 : i32
    %c0_i32_0 = arith.constant 0 : i32
    return %arg0, %c0_i32 : i32, i32
  }
  func.func @transform_1(%arg0: i32, %arg1: i32) -> (i32, i32) {
    %c0_i32 = arith.constant 0 : i32
    %c0_i32_0 = arith.constant 0 : i32
    return %c0_i32, %arg1 : i32, i32
  }
  func.func @transform_2(%arg0: i32, %arg1: i32) -> (i32, i32) {
    %c0_i32 = arith.constant 0 : i32
    %c0_i32_0 = arith.constant 0 : i32
    return %c0_i32, %arg1 : i32, i32
  }
  func.func @transform_3(%arg0: i32, %arg1: i32) -> (i32, i32) {
    %c0_i32 = arith.constant 0 : i32
    %c0_i32_0 = arith.constant 0 : i32
    return %arg1, %c0_i32 : i32, i32
  }
  func.func @transform_4(%arg0: i32, %arg1: i32) -> (i32, i32) {
    %c0_i32 = arith.constant 0 : i32
    %c0_i32_0 = arith.constant 0 : i32
    %c0_i32_1 = arith.constant 0 : i32
    return %c0_i32, %c0_i32_0 : i32, i32
  }
  func.func @transform_5(%arg0: i32, %arg1: i32) -> (i32, i32) {
    %c0_i32 = arith.constant 0 : i32
    %c0_i32_0 = arith.constant 0 : i32
    return %arg0, %c0_i32 : i32, i32
  }
}

</mosaic_0001>

<bundles_post_ra>
// kernel: tpu_custom_call.1
= control target key start
LH: loop header
LB: loop body
LE: loop exit
PB: predicated region body
PF: predicated region fallthrough
CT: control target
= control target key end

     0   :  { %10 = vsyncpa [#allocation4], 0  ;;  %s780_s0 = inlined_call_operand.hbm [shape: f32[16,128], index: 0, kind: input, shape index: {}]   ;;  %s781_s1 = inlined_call_operand.hbm [shape: f32[128,256], index: 1, kind: input, shape index: {}]   ;;  %s782_s2 = inlined_call_operand.hbm [shape: f32[1,256], index: 2, kind: input, shape index: {}]   ;;  %s783_s3 = inlined_call_operand.hbm [shape: f32[256,128], index: 3, kind: input, shape index: {}]   ;;  %s784_s4 = inlined_call_operand.vmem [shape: f32[1,128], index: 4, kind: input, shape index: {}]   ;;  %s785_s5 = inlined_call_operand.hbm [shape: f32[16,128], index: 5, kind: output, shape index: {}]  }
   0x1   :  { %11 = vsyncpa [#allocation7], 0 }
   0x2   :  { %12 = vsyncpa [#allocation10], 0  ;;  %s31_s20 = sshll.u32 %s781_s1, 4  ;;  %s32_s20 = int_to_ptr.hbm [resolvable:$true] %s31_s20 }
   0x3   :  { %13 = vsyncpa [#allocation5], 0  ;;  %s616_s21 = smov [#allocation6]   ;;  %s18_s25 = sshll.u32 %s780_s0, 4  ;;  %s19_s25 = int_to_ptr.hbm [resolvable:$true] %s18_s25 }
   0x4   :  { %s33_s22 = sshll.u32 %s616_s21, 4  ;;  %s617_s26 = smov 256   ;;  %s34_s22 = int_to_ptr.vmem [resolvable:$true] %s33_s22 }
   0x5   :  { %s618_s27 = smov 16   ;;  %s619_s28 = smov [#allocation3]  }
   0x6   :  { %39 = dma.hbm_to_vmem [thread:$0]  %s32_s20, 4096, %s34_s22, [#allocation7], %s617_s26, %s617_s26, %s618_s27  }
   0x7   :  { %s20_s29 = sshll.u32 %s619_s28, 4  ;;  %s620_s30 = smov 128   ;;  %s21_s29 = int_to_ptr.vmem [resolvable:$true] %s20_s29 }
   0x8   :  { %s621_s6 = smov 8   ;;  %s45_s8 = sshll.u32 %s782_s2, 4  ;;  %s46_s8 = int_to_ptr.hbm [resolvable:$true] %s45_s8 }
   0x9   :  { %26 = dma.hbm_to_vmem [thread:$0]  %s19_s25, 256, %s21_s29, [#allocation4], %s620_s30, %s620_s30, %s621_s6  }
   0xa   :  { %s622_s9 = smov [#allocation8]   ;;  %s55_s12 = sshll.u32 %s783_s3, 4  ;;  %s56_s12 = int_to_ptr.hbm [resolvable:$true] %s55_s12 }
   0xb   :  { %s47_s0 = sshll.u32 %s622_s9, 4  ;;  %s623_s13 = smov [#allocation9]   ;;  %s48_s0 = int_to_ptr.vmem [resolvable:$true] %s47_s0 }
   0xc   :  { %50 = dma.hbm_to_vmem [thread:$0]  %s46_s8, 32, %s48_s0, [#allocation7]  }
   0xd   :  { %s57_s14 = sshll.u32 %s623_s13, 4  ;;  %s58_s14 = int_to_ptr.vmem [resolvable:$true] %s57_s14 }
   0xe   :  { %63 = dma.hbm_to_vmem [thread:$0]  %s56_s12, 4096, %s58_s14, [#allocation10], %s620_s30, %s620_s30, %s621_s6  }
   0xf   :  { %608 = dma.done.wait [#allocation4], 256  }
  0x10   :  { %609 = vsyncadd [#allocation4], 4294967040 }
  0x11   :  { %610 = dma.done.wait [#allocation7], 4128  }
  0x12   :  { %611 = vsyncadd [#allocation7], 4294963168 }
  0x13   :  { %612 = dma.done.wait [#allocation10], 4096  }
  0x14   :  { %613 = vsyncadd [#allocation10], 4294963200  ;;  %v124_v0 = vld [vmem:[#allocation6 + $0xf0] sm:$0xff]  ;;  %v125_v1 = vld [vmem:[#allocation6 + $0xf8] sm:$0xff]  ;;  %s624_s15 = smov [#allocation11]   ;;  %s451_s19 = sshll.u32 %s785_s5, 4  ;;  %s452_s19 = int_to_ptr.hbm [resolvable:$true] %s451_s19 }
  0x15   :  { %v122_v2 = vld [vmem:[#allocation6 + $0xe0] sm:$0xff]  ;;  %132 = vmatpush.msra.mxu0 %v124_v0  ;;  %155 = vmatpush.msra.mxu1 %v125_v1  ;;  %v123_v3 = vld [vmem:[#allocation6 + $0xe8] sm:$0xff]  ;;  %v120_v4 = vld [vmem:[#allocation6 + $0xd0] sm:$0xff]  ;;  %s449_s16 = sshll.u32 %s624_s15, 4  ;;  %s450_s16 = int_to_ptr.vmem [resolvable:$true] %s449_s16 }
  0x16   :  { %v121_v5 = vld [vmem:[#allocation6 + $0xd8] sm:$0xff]  ;;  %v118_v6 = vld [vmem:[#allocation6 + $0xc0] sm:$0xff]  ;;  %v119_v7 = vld [vmem:[#allocation6 + $0xc8] sm:$0xff] }
  0x17   :  { %133 = vmatpush.msra.mxu0 %v122_v2  ;;  %156 = vmatpush.msra.mxu1 %v123_v3  ;;  %v116_v8 = vld [vmem:[#allocation6 + $0xb0] sm:$0xff]  ;;  %v117_v9 = vld [vmem:[#allocation6 + $0xb8] sm:$0xff]  ;;  %v114_v10 = vld [vmem:[#allocation6 + $0xa0] sm:$0xff] }
  0x18   :  { %v115_v11 = vld [vmem:[#allocation6 + $0xa8] sm:$0xff]  ;;  %v112_v12 = vld [vmem:[#allocation6 + $0x90] sm:$0xff]  ;;  %v113_v13 = vld [vmem:[#allocation6 + $0x98] sm:$0xff] }
  0x19   :  { %134 = vmatpush.msra.mxu0 %v120_v4  ;;  %157 = vmatpush.msra.mxu1 %v121_v5  ;;  %v110_v14 = vld [vmem:[#allocation6 + $0x80] sm:$0xff]  ;;  %v111_v15 = vld [vmem:[#allocation6 + $0x88] sm:$0xff]  ;;  %v108_v16 = vld [vmem:[#allocation6 + $0x70] sm:$0xff] }
  0x1a   :  { %v109_v17 = vld [vmem:[#allocation6 + $0x78] sm:$0xff]  ;;  %v106_v18 = vld [vmem:[#allocation6 + $0x60] sm:$0xff]  ;;  %v107_v19 = vld [vmem:[#allocation6 + $0x68] sm:$0xff] }
  0x1b   :  { %135 = vmatpush.msra.mxu0 %v118_v6  ;;  %158 = vmatpush.msra.mxu1 %v119_v7  ;;  %v104_v20 = vld [vmem:[#allocation6 + $0x50] sm:$0xff]  ;;  %v105_v21 = vld [vmem:[#allocation6 + $0x58] sm:$0xff]  ;;  %v102_v22 = vld [vmem:[#allocation6 + $0x40] sm:$0xff] }
  0x1c   :  { %v103_v23 = vld [vmem:[#allocation6 + $0x48] sm:$0xff]  ;;  %v100_v24 = vld [vmem:[#allocation6 + $0x30] sm:$0xff]  ;;  %v101_v25 = vld [vmem:[#allocation6 + $0x38] sm:$0xff] }
  0x1d   :  { %136 = vmatpush.msra.mxu0 %v116_v8  ;;  %159 = vmatpush.msra.mxu1 %v117_v9  ;;  %v98_v26 = vld [vmem:[#allocation6 + $0x20] sm:$0xff]  ;;  %v99_v27 = vld [vmem:[#allocation6 + $0x28] sm:$0xff]  ;;  %v96_v28 = vld [vmem:[#allocation6 + $0x10] sm:$0xff] }
  0x1e   :  { %v97_v29 = vld [vmem:[#allocation6 + $0x18] sm:$0xff]  ;;  %v94_v30 = vld [vmem:[#allocation6] sm:$0xff]  ;;  %v95_v31 = vld [vmem:[#allocation6 + $0x8] sm:$0xff] }
  0x1f   :  { %137 = vmatpush.msra.mxu0 %v114_v10  ;;  %160 = vmatpush.msra.mxu1 %v115_v11  ;;  %v92_v32 = vld [vmem:[#allocation3] sm:$0xff]  ;;  %v93_v33 = vld [vmem:[#allocation3 + $0x8] sm:$0xff]  ;;  %v126_v38 = vld [vmem:[#allocation8] sm:$0x3] }
  0x20   :  { %v371_v34 = vld [vmem:[#allocation9 + $0x78] sm:$0xff]  ;;  %v370_v36 = vld [vmem:[#allocation9 + $0x70] sm:$0xff]  ;;  %v369_v39 = vld [vmem:[#allocation9 + $0x68] sm:$0xff]  ;;  %v128_v41 = vperm.slane %v126_v38, 0  ;;  %v129_v42 = vperm.slane %v126_v38, 1 }
  0x21   :  { %138 = vmatpush.msra.mxu0 %v112_v12  ;;  %161 = vmatpush.msra.mxu1 %v113_v13  ;;  %v387_v35 = vld [vmem:[#allocation9 + $0xf8] sm:$0xff]  ;;  %v386_v37 = vld [vmem:[#allocation9 + $0xf0] sm:$0xff]  ;;  %v385_v40 = vld [vmem:[#allocation9 + $0xe8] sm:$0xff] }
  0x22   :  { %388 = vmatpush.msra.mxu2 %v371_v34  ;;  %411 = vmatpush.msra.mxu3 %v387_v35  ;;  %v368_v43 = vld [vmem:[#allocation9 + $0x60] sm:$0xff]  ;;  %v367_v45 = vld [vmem:[#allocation9 + $0x58] sm:$0xff]  ;;  %v366_v51 = vld [vmem:[#allocation9 + $0x50] sm:$0xff] }
  0x23   :  { %139 = vmatpush.msra.mxu0 %v110_v14  ;;  %162 = vmatpush.msra.mxu1 %v111_v15  ;;  %v384_v44 = vld [vmem:[#allocation9 + $0xe0] sm:$0xff]  ;;  %v383_v46 = vld [vmem:[#allocation9 + $0xd8] sm:$0xff]  ;;  %v382_v52 = vld [vmem:[#allocation9 + $0xd0] sm:$0xff] }
  0x24   :  { %389 = vmatpush.msra.mxu2 %v370_v36  ;;  %412 = vmatpush.msra.mxu3 %v386_v37  ;;  %v365_v55 = vld [vmem:[#allocation9 + $0x48] sm:$0xff]  ;;  %v364_v59 = vld [vmem:[#allocation9 + $0x40] sm:$0xff]  ;;  %v363_v61 = vld [vmem:[#allocation9 + $0x38] sm:$0xff] }
  0x25   :  { %140 = vmatpush.msra.mxu0 %v108_v16  ;;  %163 = vmatpush.msra.mxu1 %v109_v17  ;;  %v381_v56 = vld [vmem:[#allocation9 + $0xc8] sm:$0xff]  ;;  %v380_v60 = vld [vmem:[#allocation9 + $0xc0] sm:$0xff]  ;;  %v379_v62 = vld [vmem:[#allocation9 + $0xb8] sm:$0xff] }
  0x26   :  { %390 = vmatpush.msra.mxu2 %v369_v39  ;;  %413 = vmatpush.msra.mxu3 %v385_v40  ;;  %v362_v3 = vld [vmem:[#allocation9 + $0x30] sm:$0xff]  ;;  %v361_v9 = vld [vmem:[#allocation9 + $0x28] sm:$0xff]  ;;  %v360_v16 = vld [vmem:[#allocation9 + $0x20] sm:$0xff] }
  0x27   :  { %141 = vmatpush.msra.mxu0 %v106_v18  ;;  %164 = vmatpush.msra.mxu1 %v107_v19  ;;  %v378_v4 = vld [vmem:[#allocation9 + $0xb0] sm:$0xff]  ;;  %v377_v10 = vld [vmem:[#allocation9 + $0xa8] sm:$0xff]  ;;  %v376_v17 = vld [vmem:[#allocation9 + $0xa0] sm:$0xff] }
  0x28   :  { %391 = vmatpush.msra.mxu2 %v368_v43  ;;  %414 = vmatpush.msra.mxu3 %v384_v44  ;;  %v357_v38 = vld [vmem:[#allocation9 + $0x8] sm:$0xff] }
  0x29   :  { %142 = vmatpush.msra.mxu0 %v104_v20  ;;  %165 = vmatpush.msra.mxu1 %v105_v21  ;;  %v373_v39 = vld [vmem:[#allocation9 + $0x88] sm:$0xff] }
  0x2a   :  { %392 = vmatpush.msra.mxu2 %v367_v45  ;;  %415 = vmatpush.msra.mxu3 %v383_v46  ;;  %v356_v46 = vld [vmem:[#allocation9] sm:$0xff] }
  0x2b   :  { %143 = vmatpush.msra.mxu0 %v102_v22  ;;  %166 = vmatpush.msra.mxu1 %v103_v23 }
  0x2c   :  { %393 = vmatpush.msra.mxu2 %v366_v51  ;;  %416 = vmatpush.msra.mxu3 %v382_v52 }
  0x2d   :  { %144 = vmatpush.msra.mxu0 %v100_v24  ;;  %167 = vmatpush.msra.mxu1 %v101_v25  ;;  %v359_v24 = vld [vmem:[#allocation9 + $0x18] sm:$0xff] }
  0x2e   :  { %394 = vmatpush.msra.mxu2 %v365_v55  ;;  %417 = vmatpush.msra.mxu3 %v381_v56  ;;  %v375_v25 = vld [vmem:[#allocation9 + $0x98] sm:$0xff] }
  0x2f   :  { %145 = vmatpush.msra.mxu0 %v98_v26  ;;  %168 = vmatpush.msra.mxu1 %v99_v27 }
  0x30   :  { %395 = vmatpush.msra.mxu2 %v364_v59  ;;  %418 = vmatpush.msra.mxu3 %v380_v60 }
  0x31   :  { %146 = vmatpush.msra.mxu0 %v96_v28  ;;  %169 = vmatpush.msra.mxu1 %v97_v29 }
  0x32   :  { %396 = vmatpush.msra.mxu2 %v363_v61  ;;  %419 = vmatpush.msra.mxu3 %v379_v62 }
  0x33   :  { %147 = vmatpush.msra.mxu0 %v94_v30  ;;  %170 = vmatpush.msra.mxu1 %v95_v31 }
  0x34   :  { %148 = vmatmul.f32.vlgmr.msra.gmra.mxu0 %v92_v32  ;;  %171 = vmatmul.f32.vlgmr.msra.gmra.mxu1 %v92_v32  ;;  %v358_v32 = vld [vmem:[#allocation9 + $0x10] sm:$0xff] }
  0x35   :  { %397 = vmatpush.msra.mxu2 %v362_v3  ;;  %420 = vmatpush.msra.mxu3 %v378_v4 }
  0x37   :  { %398 = vmatpush.msra.mxu2 %v361_v9  ;;  %421 = vmatpush.msra.mxu3 %v377_v10 }
  0x39   :  { %399 = vmatpush.msra.mxu2 %v360_v16  ;;  %422 = vmatpush.msra.mxu3 %v376_v17 }
  0x3b   :  { %400 = vmatpush.msra.mxu2 %v359_v24  ;;  %423 = vmatpush.msra.mxu3 %v375_v25 }
  0x3c   :  { %151 = vmatmul.f32.gmra.mxu0 %v93_v33  ;;  %174 = vmatmul.f32.gmra.mxu1 %v93_v33  ;;  %v374_v33 = vld [vmem:[#allocation9 + $0x90] sm:$0xff] }
  0x3d   :  { %401 = vmatpush.msra.mxu2 %v358_v32  ;;  %424 = vmatpush.msra.mxu3 %v374_v33 }
  0x3f   :  { %402 = vmatpush.msra.mxu2 %v357_v38  ;;  %425 = vmatpush.msra.mxu3 %v373_v39 }
  0x41   :  { %403 = vmatpush.msra.mxu2 %v356_v46 }
  0xb1   :  { %v149_v47 = vpop.f32.mrf.mxu0  ;;  %v172_v48 = vpop.f32.mrf.mxu1 }
  0xb2   :  { %v673_v49 = vadd.f32 %v149_v47, %v128_v41  ;;  %v675_v50 = vadd.f32 %v172_v48, %v129_v42  ;;  %v372_v47 = vld [vmem:[#allocation9 + $0x80] sm:$0xff] }
  0xb3   :  { %426 = vmatpush.msra.mxu3 %v372_v47 }
  0xb4   :  { %v678_v53 = vmul.f32 0.70710677, %v673_v49  ;;  %v681_v54 = vmul.f32 0.70710677, %v675_v50 }
  0xb6   :  { %v186_v57 = vmul.f32 %v678_v53, %v678_v53  ;;  %v226_v58 = vmul.f32 %v681_v54, %v681_v54 }
  0xb8   :  { %v687_v63 = vmin.f32 %v186_v57, 16.0  ;;  %v689_v0 = vmin.f32 %v226_v58, 16.0 }
  0xb9   :  { %v152_v1 = vpop.f32.mrf.mxu0  ;;  %v175_v2 = vpop.f32.mrf.mxu1 }
  0xba   :  { %v188_v5 = vmul.f32 2.1237322e-06, %v687_v63  ;;  %v228_v6 = vmul.f32 2.1237322e-06, %v689_v0  ;;  %v693_v7 = vadd.f32 %v152_v1, %v128_v41  ;;  %v695_v8 = vadd.f32 %v175_v2, %v129_v42 }
  0xbb   :  { %v199_v11 = vmul.f32 3.8918573e-05, %v687_v63  ;;  %v239_v21 = vmul.f32 3.8918573e-05, %v689_v0 }
  0xbc   :  { %v189_v12 = vadd.f32 0.00028619796, %v188_v5  ;;  %v229_v13 = vadd.f32 0.00028619796, %v228_v6  ;;  %v699_v14 = vmul.f32 0.70710677, %v693_v7 }
  0xbd   :  { %v702_v15 = vmul.f32 0.70710677, %v695_v8  ;;  %v200_v20 = vadd.f32 0.001143296, %v199_v11  ;;  %v240_v29 = vadd.f32 0.001143296, %v239_v21 }
  0xbe   :  { %v190_v18 = vmul.f32 %v189_v12, %v687_v63  ;;  %v230_v19 = vmul.f32 %v229_v13, %v689_v0  ;;  %v266_v22 = vmul.f32 %v699_v14, %v699_v14 }
  0xbf   :  { %v306_v23 = vmul.f32 %v702_v15, %v702_v15  ;;  %v201_v28 = vmul.f32 %v200_v20, %v687_v63  ;;  %v241_v36 = vmul.f32 %v240_v29, %v689_v0 }
  0xc0   :  { %v191_v26 = vadd.f32 0.0036580483, %v190_v18  ;;  %v231_v27 = vadd.f32 0.0036580483, %v230_v19  ;;  %v712_v30 = vmin.f32 %v266_v22, 16.0 }
  0xc1   :  { %v714_v31 = vmin.f32 %v306_v23, 16.0  ;;  %v202_v35 = vadd.f32 0.014752088, %v201_v28  ;;  %v242_v44 = vadd.f32 0.014752088, %v241_v36 }
  0xc2   :  { %v192_v34 = vmul.f32 %v191_v26, %v687_v63  ;;  %v268_v37 = vmul.f32 2.1237322e-06, %v712_v30  ;;  %v279_v40 = vmul.f32 3.8918573e-05, %v712_v30  ;;  %v232_v41 = vmul.f32 %v231_v27, %v689_v0 }
  0xc3   :  { %v308_v42 = vmul.f32 2.1237322e-06, %v714_v31  ;;  %v203_v43 = vmul.f32 %v202_v35, %v687_v63  ;;  %v243_v55 = vmul.f32 %v242_v44, %v689_v0  ;;  %v319_v58 = vmul.f32 3.8918573e-05, %v714_v31 }
  0xc4   :  { %v269_v45 = vadd.f32 0.00028619796, %v268_v37  ;;  %v280_v48 = vadd.f32 0.001143296, %v279_v40  ;;  %v193_v51 = vadd.f32 0.05243302, %v192_v34 }
  0xc5   :  { %v204_v52 = vadd.f32 0.112945676, %v203_v43  ;;  %v233_v59 = vadd.f32 0.05243302, %v232_v41  ;;  %v309_v60 = vadd.f32 0.00028619796, %v308_v42 }
  0xc6   :  { %v270_v56 = vmul.f32 %v269_v45, %v712_v30  ;;  %v281_v57 = vmul.f32 %v280_v48, %v712_v30  ;;  %v244_v62 = vadd.f32 0.112945676, %v243_v55  ;;  %v194_v3 = vmul.f32 %v193_v51, %v687_v63 }
  0xc7   :  { %v205_v61 = vmul.f32 %v204_v52, %v687_v63  ;;  %v320_v9 = vadd.f32 0.001143296, %v319_v58  ;;  %v234_v10 = vmul.f32 %v233_v59, %v689_v0  ;;  %v310_v11 = vmul.f32 %v309_v60, %v714_v31 }
  0xc8   :  { %v271_v1 = vadd.f32 0.0036580483, %v270_v56  ;;  %v282_v2 = vadd.f32 0.014752088, %v281_v57  ;;  %v245_v5 = vmul.f32 %v244_v62, %v689_v0  ;;  %v195_v19 = vadd.f32 0.18741608, %v194_v3 }
  0xc9   :  { %v206_v4 = vadd.f32 0.4994258, %v205_v61  ;;  %v321_v18 = vmul.f32 %v320_v9, %v714_v31  ;;  %v235_v24 = vadd.f32 0.18741608, %v234_v10  ;;  %v311_v25 = vadd.f32 0.0036580483, %v310_v11 }
  0xca   :  { %v283_v6 = vmul.f32 %v282_v2, %v712_v30  ;;  %v246_v13 = vadd.f32 0.4994258, %v245_v5  ;;  %v272_v16 = vmul.f32 %v271_v1, %v712_v30  ;;  %v196_v29 = vmul.f32 %v195_v19, %v687_v63 }
  0xcb   :  { %v207_v12 = vmul.f32 %v206_v4, %v687_v63  ;;  %v322_v23 = vadd.f32 0.014752088, %v321_v18  ;;  %v236_v33 = vmul.f32 %v235_v24, %v689_v0  ;;  %v312_v34 = vmul.f32 %v311_v25, %v714_v31 }
  0xcc   :  { %v284_v17 = vadd.f32 0.112945676, %v283_v6  ;;  %v247_v21 = vmul.f32 %v246_v13, %v689_v0  ;;  %v273_v26 = vadd.f32 0.05243302, %v272_v16  ;;  %v197_v39 = vadd.f32 1.1283791, %v196_v29 }
  0xcd   :  { %v208_v20 = vadd.f32 1.0, %v207_v12  ;;  %v323_v28 = vmul.f32 %v322_v23, %v714_v31  ;;  %v237_v43 = vadd.f32 1.1283791, %v236_v33  ;;  %v313_v63 = vadd.f32 0.05243302, %v312_v34 }
  0xce   :  { %v285_v22 = vmul.f32 %v284_v17, %v712_v30  ;;  %v248_v27 = vadd.f32 1.0, %v247_v21  ;;  %v274_v37 = vmul.f32 %v273_v26, %v712_v30  ;;  %v198_v47 = vmul.f32 %v197_v39, %v678_v53 }
  0xcf   :  { %480 = vrcp.f32 %v208_v20  ;;  %v324_v36 = vadd.f32 0.112945676, %v323_v28  ;;  %v220_v48 = vand.u32 2147483648, %v208_v20  ;;  %v218_v55 = vand.u32 2147483647, %v208_v20 }
  0xd0   :  { %v286_v32 = vadd.f32 0.4994258, %v285_v22  ;;  %482 = vrcp.f32 %v248_v27  ;;  %v275_v0 = vadd.f32 0.18741608, %v274_v37  ;;  %v238_v57 = vmul.f32 %v237_v43, %v681_v54 }
  0xd1   :  { %v325_v41 = vmul.f32 %v324_v36, %v714_v31  ;;  %v314_v58 = vmul.f32 %v313_v63, %v714_v31  ;;  %vm214_vm1 = vweird.f32 %v208_v20  ;;  %v260_v62 = vand.u32 2147483648, %v248_v27 }
  0xd2   :  { %v287_v35 = vmul.f32 %v286_v32, %v712_v30  ;;  %v276_v60 = vmul.f32 %v275_v0, %v712_v30  ;;  %v221_v2 = vor.u32 1.1754944e-38, %v220_v48  ;;  %v258_v4 = vand.u32 2147483647, %v248_v27 }
  0xd3   :  { %v326_v46 = vadd.f32 0.4994258, %v325_v41  ;;  %vm219_vm4 = vcmp.eq.f32.partialorder %v218_v55, 8.507059e+37  ;;  %v315_v6 = vadd.f32 0.18741608, %v314_v58  ;;  %vm254_vm5 = vweird.f32 %v248_v27 }
  0xd4   :  { %v744_v40 = vadd.f32 1.0, %v287_v35  ;;  %v277_v30 = vadd.f32 1.1283791, %v276_v60  ;;  %v261_v12 = vor.u32 1.1754944e-38, %v260_v62  ;;  %vm259_vm7 = vcmp.eq.f32.partialorder %v258_v4, 8.507059e+37 }
  0xd5   :  { %v481_v38 = vpop.eup %480  ;;  %v327_v56 = vmul.f32 %v326_v46, %v714_v31  ;;  %v178_v22 = vmul.f32 0.5, %v673_v49  ;;  %v316_v25 = vmul.f32 %v315_v6, %v714_v31  ;;  %v179_v49 = vmul.f32 0.5, %v675_v50 }
  0xd6   :  { %v210_v42 = vmul.f32 %v481_v38, %v208_v20  ;;  %484 = vrcp.f32 %v744_v40  ;;  %v483_v44 = vpop.eup %482  ;;  %vm215_vm0 = vweird.f32 %v481_v38  ;;  %v298_v17 = vand.u32 2147483647, %v744_v40 }
  0xd7   :  { %v250_v51 = vmul.f32 %v483_v44, %v248_v27  ;;  %v753_v1 = vadd.f32 1.0, %v327_v56  ;;  %vm216_vm2 = vmor %vm214_vm1, %vm215_vm0  ;;  %vm255_vm3 = vweird.f32 %v483_v44  ;;  %v300_v18 = vand.u32 2147483648, %v744_v40 }
  0xd8   :  { %v211_v45 = vsub.f32 1.0, %v210_v42  ;;  %vm256_vm6 = vmor %vm254_vm5, %vm255_vm3  ;;  %vm294_vm9 = vweird.f32 %v744_v40  ;;  %v278_v33 = vmul.f32 %v277_v30, %v699_v14  ;;  %vm299_vm11 = vcmp.eq.f32.partialorder %v298_v17, 8.507059e+37 }
  0xd9   :  { %v251_v59 = vsub.f32 1.0, %v250_v51  ;;  %486 = vrcp.f32 %v753_v1  ;;  %v301_v29 = vor.u32 1.1754944e-38, %v300_v18  ;;  %v317_v31 = vadd.f32 1.1283791, %v316_v25 }
  0xda   :  { %v212_v52 = vmul.f32 %v481_v38, %v211_v45  ;;  %v338_v43 = vand.u32 2147483647, %v753_v1  ;;  %vm334_vm13 = vweird.f32 %v753_v1  ;;  %v180_v50 = vmul.f32 0.5, %v693_v7  ;;  %v479_v7 = vld [vmem:[%s784_s4] ss:$0 sm:$0xff] }
  0xdb   :  { %v252_v3 = vmul.f32 %v483_v44, %v251_v59  ;;  %v318_v45 = vmul.f32 %v317_v31, %v702_v15  ;;  %v181_v55 = vmul.f32 0.5, %v695_v8 }
  0xdc   :  { %v213_v61 = vadd.f32 %v481_v38, %v212_v52  ;;  %v485_v53 = vpop.eup %484  ;;  %vm339_vm15 = vcmp.eq.f32.partialorder %v338_v43, 8.507059e+37 }
  0xdd   :  { %v290_v54 = vmul.f32 %v485_v53, %v744_v40  ;;  %v253_v10 = vadd.f32 %v483_v44, %v252_v3  ;;  %vm295_vm8 = vweird.f32 %v485_v53  ;;  %v340_v40 = vand.u32 2147483648, %v753_v1 }
  0xde   :  { %v217_v5 = vsel %vm216_vm2, %v481_v38, %v213_v61  ;;  %vm296_vm10 = vmor %vm294_vm9, %vm295_vm8 }
  0xdf   :  { %v222_v9 = vsel %vm219_vm4, %v221_v2, %v217_v5  ;;  %v291_v13 = vsub.f32 1.0, %v290_v54  ;;  %v257_v16 = vsel %vm256_vm6, %v483_v44, %v253_v10  ;;  %v487_v24 = vpop.eup %486  ;;  %v341_v0 = vor.u32 1.1754944e-38, %v340_v40 }
  0xe0   :  { %v223_v11 = vmul.f32 %v222_v9, %v198_v47  ;;  %v262_v20 = vsel %vm259_vm7, %v261_v12, %v257_v16  ;;  %v330_v32 = vmul.f32 %v487_v24, %v753_v1  ;;  %vm335_vm12 = vweird.f32 %v487_v24 }
  0xe1   :  { %v292_v21 = vmul.f32 %v485_v53, %v291_v13  ;;  %v263_v23 = vmul.f32 %v262_v20, %v238_v57  ;;  %vm336_vm14 = vmor %vm334_vm13, %vm335_vm12 }
  0xe2   :  { %v466_v19 = vclamps-f32 %v223_v11, 1.0  ;;  %v331_v38 = vsub.f32 1.0, %v330_v32 }
  0xe3   :  { %v293_v27 = vadd.f32 %v485_v53, %v292_v21  ;;  %v467_v28 = vclamps-f32 %v263_v23, 1.0 }
  0xe4   :  { %v346_v26 = vadd.f32 1.0, %v466_v19  ;;  %v332_v42 = vmul.f32 %v487_v24, %v331_v38 }
  0xe5   :  { %v297_v35 = vsel %vm296_vm10, %v485_v53, %v293_v27  ;;  %v347_v36 = vadd.f32 1.0, %v467_v28 }
  0xe6   :  { %v350_v34 = vmul.f32 %v346_v26, %v178_v22  ;;  %v302_v37 = vsel %vm299_vm11, %v301_v29, %v297_v35  ;;  %v333_v14 = vadd.f32 %v487_v24, %v332_v42 }
  0xe7   :  { %v303_v39 = vmul.f32 %v302_v37, %v278_v33  ;;  %v351_v41 = vmul.f32 %v347_v36, %v179_v49 }
  0xe8   :  { %404 = vmatmul.f32.vlgmr.msra.gmra.mxu2 %v350_v34  ;;  %v337_v46 = vsel %vm336_vm14, %v487_v24, %v333_v14 }
  0xe9   :  { %v468_v63 = vclamps-f32 %v303_v39, 1.0  ;;  %427 = vmatmul.f32.vlgmr.msra.gmra.mxu3 %v351_v41  ;;  %v342_v48 = vsel %vm339_vm15, %v341_v0, %v337_v46 }
  0xea   :  { %v343_v51 = vmul.f32 %v342_v48, %v318_v45 }
  0xeb   :  { %v348_v44 = vadd.f32 1.0, %v468_v63 }
  0xec   :  { %v469_v52 = vclamps-f32 %v343_v51, 1.0 }
  0xed   :  { %v352_v47 = vmul.f32 %v348_v44, %v180_v50 }
  0xee   :  { %v349_v56 = vadd.f32 1.0, %v469_v52 }
  0xf0   :  { %407 = vmatmul.f32.gmra.mxu2 %v352_v47  ;;  %v353_v57 = vmul.f32 %v349_v56, %v181_v55 }
  0xf2   :  { %430 = vmatmul.f32.gmra.mxu3 %v353_v57 }
 0x16b   :  { %v405_v58 = vpop.f32.mrf.mxu2 }
 0x16c   :  { %v428_v59 = vpop.f32.mrf.mxu3 }
 0x16d   :  { %v429_v60 = vadd.f32 %v428_v59, %v405_v58 }
 0x16f   :  { %v434_v15 = vadd.f32 %v479_v7, %v429_v60 }
 0x171   :  { %443 = vst [vmem:[#allocation11] sm:$0xff] %v434_v15 }
 0x173   :  { %v408_v61 = vpop.f32.mrf.mxu2 }
 0x175   :  { %v431_v62 = vpop.f32.mrf.mxu3 }
 0x176   :  { %v432_v8 = vadd.f32 %v431_v62, %v408_v61 }
 0x178   :  { %v435_v1 = vadd.f32 %v479_v7, %v432_v8 }
 0x17a   :  { %444 = vst [vmem:[#allocation11 + $0x8] sm:$0xff] %v435_v1 }
 0x17b   :  { %457 = dma.vmem_to_hbm [thread:$0]  %s450_s16, 256, %s452_s19, [#allocation5], %s620_s30, %s620_s30, %s621_s6  }
 0x17c   :  { %614 = dma.done.wait [#allocation5], 256  }
 0x17d   :  { %615 = vsyncadd [#allocation5], 4294967040 }
 0x17e   :  { %462 = vsyncpa [#allocation4], 1 }
 0x17f   :  { %463 = vsyncpa [#allocation7], 1 }
 0x180   :  { %464 = vsyncpa [#allocation10], 1 }
 0x181   :  { %465 = vsyncpa [#allocation5], 1 }

</bundles_post_ra>
